<compile_context>
chip_gen: v6e
topology: v6e:2x2x1
jax: 0.10.0
libtpu: 0.0.40
codegen_flags: <defaults>
</compile_context>

<pallas_src>
import math
import jax
import jax.numpy as jnp
from jax.experimental import pallas as pl
from jax.experimental.pallas import tpu as pltpu

LANE = 128
VMEM_TILE_BUDGET = 24 << 20     # conservative: fits v7x (64 MiB phys) / v5e scoped limits
VMEM_LIMIT_BYTES = 32 << 20


# ----------------------------------------------------------------------------
# Single-step fused kernel (K fits in one block): relu(x@w1 + b1) @ w2 + b2
# ----------------------------------------------------------------------------
def _mlp_fused_kernel(x_ref, w1_ref, b1_ref, w2_ref, b2_ref, o_ref):
    h = jnp.dot(x_ref[...], w1_ref[...], preferred_element_type=jnp.float32)
    h = jnp.maximum(h + b1_ref[...], 0.0)                       # bias + ReLU in f32
    o_ref[...] = (jnp.dot(h.astype(w2_ref.dtype), w2_ref[...],
                          preferred_element_type=jnp.float32)
                  + b2_ref[...]).astype(o_ref.dtype)


# ----------------------------------------------------------------------------
# K-tiled kernel (large D): acc += x_tile @ w1_tile ; finalize on last k-step
# ----------------------------------------------------------------------------
def _mlp_tiled_kernel(x_ref, w1_ref, b1_ref, w2_ref, b2_ref, o_ref, acc_ref):
    k = pl.program_id(1)

    @pl.when(k == 0)
    def _():
        acc_ref[...] = jnp.zeros_like(acc_ref)

    acc_ref[...] += jnp.dot(x_ref[...], w1_ref[...],
                            preferred_element_type=jnp.float32)

    @pl.when(k == pl.num_programs(1) - 1)
    def _():
        h = jnp.maximum(acc_ref[...] + b1_ref[...], 0.0)        # f32 epilogue
        o_ref[...] = (jnp.dot(h.astype(w2_ref.dtype), w2_ref[...],
                              preferred_element_type=jnp.float32)
                      + b2_ref[...]).astype(o_ref.dtype)


# ----------------------------------------------------------------------------
# Tile chooser: batch tile tm + VMEM-budgeted reduction tile tk
# ----------------------------------------------------------------------------
def _choose_tiles(B, D, H, Np, itemsize, vmem_budget=VMEM_TILE_BUDGET):
    # Batch tile: largest MXU-friendly divisor of B (multiple of 8), else full B
    # (a full-extent block is legal even when B is not a multiple of 8).
    tm = B
    for cand in (256, 128, 64, 32, 16, 8):
        if B >= cand and B % cand == 0:
            tm = cand
            break

    # Bytes that are resident independent of tk: w2 (dbuf), b1/b2, out block (dbuf),
    # accumulator scratch (f32). Slight over-count for the single-block case; harmless.
    resident = (2 * H * Np * itemsize            # w2 (double-buffered by pipeline)
                + (H + Np) * 4                   # b1, b2 (f32)
                + 2 * tm * Np * 4                # output block
                + tm * H * 4)                    # accumulator

    def k_bytes(tk):
        # x tile + w1 tile, both double-buffered by the pipeline.
        return 2 * (tm * tk + tk * H) * itemsize

    # Single full-D block if it fits (or if D is not 128-aligned: full-extent block
    # avoids any padding copy of the big operands).
    if D % 128 != 0 or resident + k_bytes(D) <= vmem_budget:
        return tm, D

    # Otherwise: largest 128-multiple divisor of D whose double-buffered tiles fit
    # the budget (naturally gives MiB-scale w1 tiles and amortizes per-step overhead).
    tk = 128
    for cand in range(D // 128, 0, -1):
        t = cand * 128
        if D % t == 0 and resident + k_bytes(t) <= vmem_budget:
            tk = t
            break
    return tm, tk


# ----------------------------------------------------------------------------
# Wrapper
# ----------------------------------------------------------------------------
def mlp_forward(params, x, *, use_bf16=False):
    """x: (B, ...) -> flatten -> Linear -> ReLU -> Linear -> (B, 10) logits.

    use_bf16=True streams x/w1/w2 as bf16 into the MXU (halves dominant HBM bytes);
    biases and all epilogue math stay in f32. Default False = exact f32 semantics.
    """
    B = x.shape[0]
    x2 = x.reshape(B, -1).astype(jnp.float32)
    D = x2.shape[1]

    w1, b1, w2, b2 = params["w1"], params["b1"], params["w2"], params["b2"]
    H = w1.shape[1]
    n_out = w2.shape[1]

    # Lane-dense output slab: pad the 10-wide output weights/bias to 128 lanes.
    Np = max(LANE, ((n_out + LANE - 1) // LANE) * LANE)
    w2_p = jnp.pad(w2, ((0, 0), (0, Np - n_out)))
    b2_p = jnp.pad(b2.reshape(1, n_out), ((0, 0), (0, Np - n_out))).astype(jnp.float32)
    b1_r = b1.reshape(1, H).astype(jnp.float32)

    if use_bf16:
        x_in = x2.astype(jnp.bfloat16)
        w1_in = w1.astype(jnp.bfloat16)
        w2_in = w2_p.astype(jnp.bfloat16)
        itemsize = 2
    else:
        x_in, w1_in, w2_in = x2, w1, w2_p
        itemsize = 4

    tm, tk = _choose_tiles(B, D, H, Np, itemsize)
    m_blocks = B // tm
    k_blocks = D // tk

    cost = pl.CostEstimate(
        flops=2 * B * D * H + 2 * B * H * Np,
        transcendentals=0,
        bytes_accessed=(B * D + D * H + H * Np) * itemsize + (H + Np) * 4 + B * Np * 4,
    )
    cparams_common = dict(vmem_limit_bytes=VMEM_LIMIT_BYTES)

    if k_blocks == 1:
        # ---- single-K-step path: no scratch, no pl.when, batch-parallel grid ----
        out = pl.pallas_call(
            _mlp_fused_kernel,
            out_shape=jax.ShapeDtypeStruct((B, Np), jnp.float32),
            grid_spec=pltpu.PrefetchScalarGridSpec(
                num_scalar_prefetch=0,
                grid=(m_blocks,),
                in_specs=[
                    pl.BlockSpec((tm, D), lambda m: (m, 0)),    # x (batch-tiled)
                    pl.BlockSpec((D, H), lambda m: (0, 0)),     # w1 (resident)
                    pl.BlockSpec((1, H), lambda m: (0, 0)),     # b1
                    pl.BlockSpec((H, Np), lambda m: (0, 0)),    # w2 (resident)
                    pl.BlockSpec((1, Np), lambda m: (0, 0)),    # b2
                ],
                out_specs=pl.BlockSpec((tm, Np), lambda m: (m, 0)),
            ),
            compiler_params=pltpu.CompilerParams(
                dimension_semantics=("parallel",), **cparams_common),
            cost_estimate=cost,
        )(x_in, w1_in, b1_r, w2_in, b2_p)
    else:
        # ---- K-tiled path: batch-parallel outer axis, reduction inner axis ----
        out = pl.pallas_call(
            _mlp_tiled_kernel,
            out_shape=jax.ShapeDtypeStruct((B, Np), jnp.float32),
            grid_spec=pltpu.PrefetchScalarGridSpec(
                num_scalar_prefetch=0,
                grid=(m_blocks, k_blocks),
                in_specs=[
                    pl.BlockSpec((tm, tk), lambda m, k: (m, k)),   # x tile
                    pl.BlockSpec((tk, H), lambda m, k: (k, 0)),    # w1 tile (streamed)
                    pl.BlockSpec((1, H), lambda m, k: (0, 0)),     # b1 (resident)
                    pl.BlockSpec((H, Np), lambda m, k: (0, 0)),    # w2 (resident)
                    pl.BlockSpec((1, Np), lambda m, k: (0, 0)),    # b2 (resident)
                ],
                out_specs=pl.BlockSpec((tm, Np), lambda m, k: (m, 0)),
                scratch_shapes=[pltpu.VMEM((tm, H), jnp.float32)],
            ),
            compiler_params=pltpu.CompilerParams(
                dimension_semantics=("parallel", "arbitrary"), **cparams_common),
            cost_estimate=cost,
        )(x_in, w1_in, b1_r, w2_in, b2_p)

    return out[:, :n_out]


# ----------------------------------------------------------------------------
# Parameters (PyTorch nn.Linear default init; weights stored as (in, out) = W.T)
# ----------------------------------------------------------------------------
def make_params(key, input_shape, n_filters, n_out=10):
    k1, k2, k3, k4 = jax.random.split(key, 4)
    bnd1 = 1.0 / math.sqrt(input_shape)
    bnd2 = 1.0 / math.sqrt(n_filters)
    return {
        "w1": jax.random.uniform(k1, (input_shape, n_filters), jnp.float32, -bnd1, bnd1),
        "b1": jax.random.uniform(k2, (n_filters,), jnp.float32, -bnd1, bnd1),
        "w2": jax.random.uniform(k3, (n_filters, n_out), jnp.float32, -bnd2, bnd2),
        "b2": jax.random.uniform(k4, (n_out,), jnp.float32, -bnd2, bnd2),
    }


if __name__ == "__main__":
    key = jax.random.PRNGKey(0)
    pkey, xkey = jax.random.split(key)

    # Small shapes consistent with the module: batch=2, channels=4, spatial=16x16
    # -> input_shape = 4*16*16 = 1024, n_filters = 32, 10 outputs.
    B, C, Hs, Ws = 2, 4, 16, 16
    D = C * Hs * Ws
    n_filters = 32

    params = make_params(pkey, D, n_filters)
    x = jax.random.normal(xkey, (B, C, Hs, Ws), jnp.float32)

    fwd = jax.jit(lambda inp: mlp_forward(params, inp))   # exact f32 path
    out = fwd(x)
    jax.block_until_ready(out)

    # pure-JAX reference (same math as the PyTorch forward)
    xr = x.reshape(B, -1)
    ref = jnp.maximum(xr @ params["w1"] + params["b1"], 0.0) @ params["w2"] + params["b2"]

    assert out.shape == (B, 10)
    assert bool(jnp.allclose(out, ref, atol=1e-4, rtol=1e-4))
    print("KERNEL_OK")
</pallas_src>

<mosaic_0001>
module attributes {stable_mosaic.version = 11 : i64} {
  func.func @_mlp_fused_kernel(%arg0: i32, %arg1: memref<2x1024xf32, #tpu.memory_space<vmem>>, %arg2: memref<1024x32xf32, #tpu.memory_space<vmem>>, %arg3: memref<1x32xf32, #tpu.memory_space<vmem>>, %arg4: memref<32x128xf32, #tpu.memory_space<vmem>>, %arg5: memref<1x128xf32, #tpu.memory_space<vmem>>, %arg6: memref<2x128xf32, #tpu.memory_space<vmem>>) attributes {dimension_semantics = [#tpu.dimension_semantics<parallel>], iteration_bounds = array<i64: 1>, scalar_prefetch = 0 : i64, scratch_operands = 0 : i64, tpu.core_type = #tpu.core_type<tc>, window_params = [{transform_indices = @transform_0, window_bounds = array<i64: 2, 1024>}, {pipeline_mode = #tpu.pipeline_mode<synchronous>, transform_indices = @transform_1, window_bounds = array<i64: 1024, 32>}, {pipeline_mode = #tpu.pipeline_mode<synchronous>, transform_indices = @transform_2, window_bounds = array<i64: 1, 32>}, {pipeline_mode = #tpu.pipeline_mode<synchronous>, transform_indices = @transform_3, window_bounds = array<i64: 32, 128>}, {pipeline_mode = #tpu.pipeline_mode<synchronous>, transform_indices = @transform_4, window_bounds = array<i64: 1, 128>}, {transform_indices = @transform_5, window_bounds = array<i64: 2, 128>}]} {
    %c0 = arith.constant 0 : index
    %c0_0 = arith.constant 0 : index
    %0 = vector.load %arg1[%c0, %c0_0] : memref<2x1024xf32, #tpu.memory_space<vmem>>, vector<2x1024xf32>
    %c0_1 = arith.constant 0 : index
    %c0_2 = arith.constant 0 : index
    %1 = vector.load %arg2[%c0_1, %c0_2] : memref<1024x32xf32, #tpu.memory_space<vmem>>, vector<1024x32xf32>
    %cst = arith.constant dense<0.000000e+00> : vector<2x32xf32>
    %2 = tpu.matmul %0, %1, %cst {dimension_numbers = #tpu.dot_dimension_numbers<[1], [0], [0], [1], [0, 0, 1, 1], [], []>} : vector<2x1024xf32>, vector<1024x32xf32>, vector<2x32xf32> -> vector<2x32xf32>
    %c0_3 = arith.constant 0 : index
    %c0_4 = arith.constant 0 : index
    %3 = vector.load %arg3[%c0_3, %c0_4] : memref<1x32xf32, #tpu.memory_space<vmem>>, vector<1x32xf32>
    %4 = vector.broadcast %3 : vector<1x32xf32> to vector<2x32xf32>
    %5 = arith.addf %2, %4 : vector<2x32xf32>
    %cst_5 = arith.constant 0.000000e+00 : f32
    %6 = vector.broadcast %cst_5 : f32 to vector<2x32xf32>
    %7 = arith.maximumf %5, %6 : vector<2x32xf32>
    %c0_6 = arith.constant 0 : index
    %c0_7 = arith.constant 0 : index
    %8 = vector.load %arg4[%c0_6, %c0_7] : memref<32x128xf32, #tpu.memory_space<vmem>>, vector<32x128xf32>
    %cst_8 = arith.constant dense<0.000000e+00> : vector<2x128xf32>
    %9 = tpu.matmul %7, %8, %cst_8 {dimension_numbers = #tpu.dot_dimension_numbers<[1], [0], [0], [1], [0, 0, 1, 1], [], []>} : vector<2x32xf32>, vector<32x128xf32>, vector<2x128xf32> -> vector<2x128xf32>
    %c0_9 = arith.constant 0 : index
    %c0_10 = arith.constant 0 : index
    %10 = vector.load %arg5[%c0_9, %c0_10] : memref<1x128xf32, #tpu.memory_space<vmem>>, vector<1x128xf32>
    %11 = vector.broadcast %10 : vector<1x128xf32> to vector<2x128xf32>
    %12 = arith.addf %9, %11 : vector<2x128xf32>
    %c0_11 = arith.constant 0 : index
    %c0_12 = arith.constant 0 : index
    %13 = vector.load %arg6[%c0_11, %c0_12] : memref<2x128xf32, #tpu.memory_space<vmem>>, vector<2x128xf32>
    tpu.vector_store %arg6[%c0_11, %c0_12], %12 {strides = array<i32>} : memref<2x128xf32, #tpu.memory_space<vmem>>, vector<2x128xf32>,
    return
  }
  func.func @transform_0(%arg0: i32) -> (i32, i32) {
    %c0_i32 = arith.constant 0 : i32
    %c0_i32_0 = arith.constant 0 : i32
    return %arg0, %c0_i32 : i32, i32
  }
  func.func @transform_1(%arg0: i32) -> (i32, i32) {
    %c0_i32 = arith.constant 0 : i32
    %c0_i32_0 = arith.constant 0 : i32
    %c0_i32_1 = arith.constant 0 : i32
    return %c0_i32, %c0_i32_0 : i32, i32
  }
  func.func @transform_2(%arg0: i32) -> (i32, i32) {
    %c0_i32 = arith.constant 0 : i32
    %c0_i32_0 = arith.constant 0 : i32
    %c0_i32_1 = arith.constant 0 : i32
    return %c0_i32, %c0_i32_0 : i32, i32
  }
  func.func @transform_3(%arg0: i32) -> (i32, i32) {
    %c0_i32 = arith.constant 0 : i32
    %c0_i32_0 = arith.constant 0 : i32
    %c0_i32_1 = arith.constant 0 : i32
    return %c0_i32, %c0_i32_0 : i32, i32
  }
  func.func @transform_4(%arg0: i32) -> (i32, i32) {
    %c0_i32 = arith.constant 0 : i32
    %c0_i32_0 = arith.constant 0 : i32
    %c0_i32_1 = arith.constant 0 : i32
    return %c0_i32, %c0_i32_0 : i32, i32
  }
  func.func @transform_5(%arg0: i32) -> (i32, i32) {
    %c0_i32 = arith.constant 0 : i32
    %c0_i32_0 = arith.constant 0 : i32
    return %arg0, %c0_i32 : i32, i32
  }
}

</mosaic_0001>

<bundles_post_ra>
// kernel: _lambda_.1
= control target key start
LH: loop header
LB: loop body
LE: loop exit
PB: predicated region body
PF: predicated region fallthrough
CT: control target
= control target key end

     0   :  { %10 = vsyncpa [#allocation3], 0  ;;  %s883_s0 = inlined_call_operand.vmem [shape: f32[2,1024], index: 0, kind: input, shape index: {}]   ;;  %s884_s1 = inlined_call_operand.hbm [shape: f32[1024,32], index: 1, kind: input, shape index: {}]   ;;  %s885_s2 = inlined_call_operand.vmem [shape: f32[1,32], index: 2, kind: input, shape index: {}]   ;;  %s886_s3 = inlined_call_operand.vmem [shape: f32[32,128], index: 3, kind: input, shape index: {}]   ;;  %s887_s4 = inlined_call_operand.vmem [shape: f32[1,128], index: 4, kind: input, shape index: {}]   ;;  %s888_s5 = inlined_call_operand.hbm [shape: f32[2,128], index: 5, kind: output, shape index: {}]  }
   0x1   :  { %11 = vsyncpa [#allocation4], 0  ;;  %s810_s18 = smov [#allocation2]  }
   0x2   :  { %s19_s19 = sshll.u32 %s810_s18, 4  ;;  %s20_s19 = int_to_ptr.vmem [resolvable:$true] %s19_s19 }
   0x3   :  { %s774_s20 = scalar_lea.vmem %s20_s19, 16384  ;;  %p779_p1 = scmp.lt.s32.totalorder %s20_s19, %s20_s19 }
   0x4   :  { %p775_p0 = scmp.ne.s32.totalorder %s20_s19, %s774_s20  ;;  %p780_p2 = scmp.lt.s32.totalorder %s774_s20, %s774_s20 }
   0x6   :  { %p781_p3 = por %p780_p2, %p779_p1 }
   0x8   :  { %p782_p4 = pnand %p781_p3, %p775_p0 }
   0xa   :  { %785 = shalt.err (!%p782_p4)
}
   0xb   :  { %s811_s21 = smov 128   ;;  %s812_s22 = smov 8  }
   0xc   :  { %25 = dma.hbm_to_vmem [thread:$0]  %s884_s1, 16384, %s20_s19, [#allocation3], %s811_s21, %s811_s21, %s812_s22  }
   0xd   :  { %806 = dma.done.wait [#allocation3], 16384  }
   0xe   :  { %807 = vsyncadd [#allocation3], 4294950912  ;;  %v68_v0 = vld [vmem:[#allocation2 + $0xf8] sm:$0xff]  ;;  %v67_v4 = vld [vmem:[#allocation2 + $0xf0] sm:$0xff]  ;;  %v813_v30 = vmov 1983009808   ;;  %v178_v32 = vlaneseq }
   0xf   :  { %v100_v1 = vld [vmem:[#allocation2 + $0x1f8] sm:$0xff]  ;;  %601 = vmatprep.subr.mxu0 %v68_v0  ;;  %v99_v5 = vld [vmem:[#allocation2 + $0x1f0] sm:$0xff]  ;;  %v66_v8 = vld [vmem:[#allocation2 + $0xe8] sm:$0xff]  ;;  %v176_v31 = vunpack.c.l.s4 %v813_v30  ;;  %vm815_vm0 = vmmov 0   ;;  %vm508_vm1 = vcmask 261120  }
  0x10   :  { %v52_v2 = vld [vmem:[#allocation2 + $0x78] sm:$0xff]  ;;  %636 = vmatprep.subr.mxu1 %v100_v1  ;;  %v51_v6 = vld [vmem:[#allocation2 + $0x70] sm:$0xff]  ;;  %v98_v9 = vld [vmem:[#allocation2 + $0x1e8] sm:$0xff]  ;;  %v179_v42 = vshrl.u32 %v178_v32, 7 }
  0x11   :  { %v84_v3 = vld [vmem:[#allocation2 + $0x178] sm:$0xff]  ;;  %602 = vmatpush3.msra.mxu0 %v52_v2  ;;  %v83_v7 = vld [vmem:[#allocation2 + $0x170] sm:$0xff]  ;;  %v50_v10 = vld [vmem:[#allocation2 + $0x68] sm:$0xff]  ;;  %v177_v41 = vunpack.c.0.s8 %v176_v31 }
  0x12   :  { %637 = vmatpush3.msra.mxu1 %v84_v3  ;;  %603 = vmatprep.subr.mxu0 %v67_v4  ;;  %v82_v11 = vld [vmem:[#allocation2 + $0x168] sm:$0xff]  ;;  %v65_v12 = vld [vmem:[#allocation2 + $0xe0] sm:$0xff]  ;;  %v64_v16 = vld [vmem:[#allocation2 + $0xd8] sm:$0xff] }
  0x13   :  { %638 = vmatprep.subr.mxu1 %v99_v5  ;;  %604 = vmatpush3.msra.mxu0 %v51_v6  ;;  %v97_v13 = vld [vmem:[#allocation2 + $0x1e0] sm:$0xff]  ;;  %v96_v17 = vld [vmem:[#allocation2 + $0x1d8] sm:$0xff]  ;;  %v63_v20 = vld [vmem:[#allocation2 + $0xd0] sm:$0xff]  ;;  %v850_v51 = vsub.s32 %v177_v41, %v179_v42 }
  0x14   :  { %639 = vmatpush3.msra.mxu1 %v83_v7  ;;  %605 = vmatprep.subr.mxu0 %v66_v8  ;;  %v49_v14 = vld [vmem:[#allocation2 + $0x60] sm:$0xff]  ;;  %v48_v18 = vld [vmem:[#allocation2 + $0x58] sm:$0xff]  ;;  %v95_v21 = vld [vmem:[#allocation2 + $0x1d0] sm:$0xff] }
  0x15   :  { %640 = vmatprep.subr.mxu1 %v98_v9  ;;  %v81_v15 = vld [vmem:[#allocation2 + $0x160] sm:$0xff]  ;;  %606 = vmatpush3.msra.mxu0 %v50_v10  ;;  %v80_v19 = vld [vmem:[#allocation2 + $0x158] sm:$0xff]  ;;  %v47_v22 = vld [vmem:[#allocation2 + $0x50] sm:$0xff] }
  0x16   :  { %641 = vmatpush3.msra.mxu1 %v82_v11  ;;  %607 = vmatprep.subr.mxu0 %v65_v12  ;;  %v79_v23 = vld [vmem:[#allocation2 + $0x150] sm:$0xff]  ;;  %v62_v24 = vld [vmem:[#allocation2 + $0xc8] sm:$0xff]  ;;  %v61_v28 = vld [vmem:[#allocation2 + $0xc0] sm:$0xff] }
  0x17   :  { %642 = vmatprep.subr.mxu1 %v97_v13  ;;  %608 = vmatpush3.msra.mxu0 %v49_v14  ;;  %v94_v25 = vld [vmem:[#allocation2 + $0x1c8] sm:$0xff]  ;;  %v93_v29 = vld [vmem:[#allocation2 + $0x1c0] sm:$0xff]  ;;  %v60_v35 = vld [vmem:[#allocation2 + $0xb8] sm:$0xff] }
  0x18   :  { %643 = vmatpush3.msra.mxu1 %v81_v15  ;;  %609 = vmatprep.subr.mxu0 %v64_v16  ;;  %v46_v26 = vld [vmem:[#allocation2 + $0x48] sm:$0xff]  ;;  %v45_v33 = vld [vmem:[#allocation2 + $0x40] sm:$0xff]  ;;  %v92_v36 = vld [vmem:[#allocation2 + $0x1b8] sm:$0xff] }
  0x19   :  { %644 = vmatprep.subr.mxu1 %v96_v17  ;;  %610 = vmatpush3.msra.mxu0 %v48_v18  ;;  %v78_v27 = vld [vmem:[#allocation2 + $0x148] sm:$0xff]  ;;  %v77_v34 = vld [vmem:[#allocation2 + $0x140] sm:$0xff]  ;;  %v44_v37 = vld [vmem:[#allocation2 + $0x38] sm:$0xff] }
  0x1a   :  { %645 = vmatpush3.msra.mxu1 %v80_v19  ;;  %611 = vmatprep.subr.mxu0 %v63_v20  ;;  %v76_v38 = vld [vmem:[#allocation2 + $0x138] sm:$0xff]  ;;  %v59_v39 = vld [vmem:[#allocation2 + $0xb0] sm:$0xff]  ;;  %v58_v45 = vld [vmem:[#allocation2 + $0xa8] sm:$0xff] }
  0x1b   :  { %646 = vmatprep.subr.mxu1 %v95_v21  ;;  %612 = vmatpush3.msra.mxu0 %v47_v22  ;;  %v91_v40 = vld [vmem:[#allocation2 + $0x1b0] sm:$0xff]  ;;  %v90_v46 = vld [vmem:[#allocation2 + $0x1a8] sm:$0xff]  ;;  %v57_v49 = vld [vmem:[#allocation2 + $0xa0] sm:$0xff] }
  0x1c   :  { %647 = vmatpush3.msra.mxu1 %v79_v23  ;;  %613 = vmatprep.subr.mxu0 %v62_v24  ;;  %v43_v43 = vld [vmem:[#allocation2 + $0x30] sm:$0xff]  ;;  %v42_v47 = vld [vmem:[#allocation2 + $0x28] sm:$0xff]  ;;  %v89_v50 = vld [vmem:[#allocation2 + $0x1a0] sm:$0xff] }
  0x1d   :  { %648 = vmatprep.subr.mxu1 %v94_v25  ;;  %614 = vmatpush3.msra.mxu0 %v46_v26  ;;  %v75_v44 = vld [vmem:[#allocation2 + $0x130] sm:$0xff]  ;;  %v74_v48 = vld [vmem:[#allocation2 + $0x128] sm:$0xff]  ;;  %v41_v52 = vld [vmem:[#allocation2 + $0x20] sm:$0xff] }
  0x1e   :  { %649 = vmatpush3.msra.mxu1 %v78_v27  ;;  %615 = vmatprep.subr.mxu0 %v61_v28  ;;  %v73_v53 = vld [vmem:[#allocation2 + $0x120] sm:$0xff]  ;;  %v56_v55 = vld [vmem:[#allocation2 + $0x98] sm:$0xff]  ;;  %v55_v60 = vld [vmem:[#allocation2 + $0x90] sm:$0xff] }
  0x1f   :  { %650 = vmatprep.subr.mxu1 %v93_v29  ;;  %616 = vmatpush3.msra.mxu0 %v45_v33  ;;  %v35_v54 = vld [vmem:[%s883_s0] sm:$0xff]  ;;  %v88_v56 = vld [vmem:[#allocation2 + $0x198] sm:$0xff]  ;;  %v87_v61 = vld [vmem:[#allocation2 + $0x190] sm:$0xff] }
  0x20   :  { %651 = vmatpush3.msra.mxu1 %v77_v34  ;;  %617 = vmatprep.subr.mxu0 %v60_v35  ;;  %v174_v57 = vcombine.high %v35_v54, %v35_v54  ;;  %v40_v58 = vld [vmem:[#allocation2 + $0x18] sm:$0xff]  ;;  %v181_v62 = vrot.slane %v35_v54, %v850_v51  ;;  %v39_v63 = vld [vmem:[#allocation2 + $0x10] sm:$0xff]  ;;  %v54_v1 = vld [vmem:[#allocation2 + $0x88] sm:$0xff] }
  0x21   :  { %652 = vmatprep.subr.mxu1 %v92_v36  ;;  %618 = vmatpush3.msra.mxu0 %v44_v37  ;;  %v72_v59 = vld [vmem:[#allocation2 + $0x118] sm:$0xff]  ;;  %v71_v0 = vld [vmem:[#allocation2 + $0x110] sm:$0xff]  ;;  %v86_v2 = vld [vmem:[#allocation2 + $0x188] sm:$0xff] }
  0x22   :  { %653 = vmatpush3.msra.mxu1 %v76_v38  ;;  %619 = vmatprep.subr.mxu0 %v59_v39  ;;  %v188_v3 = vrot.slane %v174_v57, %v850_v51  ;;  %v38_v4 = vld [vmem:[#allocation2 + $0x8] sm:$0xff]  ;;  %v53_v6 = vld [vmem:[#allocation2 + $0x80] sm:$0xff]  ;;  %v189_v8 = vcombine.high %v181_v62, %v181_v62  ;;  %v132_v12 = vld [vmem:[#allocation2 + $0x2f8] sm:$0xff] }
  0x23   :  { %654 = vmatprep.subr.mxu1 %v91_v40  ;;  %620 = vmatpush3.msra.mxu0 %v43_v43  ;;  %v70_v5 = vld [vmem:[#allocation2 + $0x108] sm:$0xff]  ;;  %v85_v7 = vld [vmem:[#allocation2 + $0x180] sm:$0xff]  ;;  %v164_v13 = vld [vmem:[#allocation2 + $0x3f8] sm:$0xff] }
  0x24   :  { %655 = vmatpush3.msra.mxu1 %v75_v44  ;;  %621 = vmatprep.subr.mxu0 %v58_v45  ;;  %v37_v9 = vld [vmem:[#allocation2] sm:$0xff]  ;;  %v190_v11 = vcombine.high %v188_v3, %v188_v3  ;;  %v116_v14 = vld [vmem:[#allocation2 + $0x278] sm:$0xff]  ;;  %v131_v16 = vld [vmem:[#allocation2 + $0x2f0] sm:$0xff] }
  0x25   :  { %656 = vmatprep.subr.mxu1 %v90_v46  ;;  %622 = vmatpush3.msra.mxu0 %v42_v47  ;;  %v69_v10 = vld [vmem:[#allocation2 + $0x100] sm:$0xff]  ;;  %v148_v15 = vld [vmem:[#allocation2 + $0x378] sm:$0xff]  ;;  %v163_v17 = vld [vmem:[#allocation2 + $0x3f0] sm:$0xff] }
  0x26   :  { %657 = vmatpush3.msra.mxu1 %v74_v48  ;;  %623 = vmatprep.subr.mxu0 %v57_v49  ;;  %v115_v18 = vld [vmem:[#allocation2 + $0x270] sm:$0xff]  ;;  %v130_v20 = vld [vmem:[#allocation2 + $0x2e8] sm:$0xff]  ;;  %v129_v24 = vld [vmem:[#allocation2 + $0x2e0] sm:$0xff] }
  0x27   :  { %658 = vmatprep.subr.mxu1 %v89_v50  ;;  %624 = vmatpush3.msra.mxu0 %v41_v52  ;;  %v147_v19 = vld [vmem:[#allocation2 + $0x370] sm:$0xff]  ;;  %v162_v21 = vld [vmem:[#allocation2 + $0x3e8] sm:$0xff]  ;;  %v161_v25 = vld [vmem:[#allocation2 + $0x3e0] sm:$0xff] }
  0x28   :  { %659 = vmatpush3.msra.mxu1 %v73_v53  ;;  %625 = vmatprep.subr.mxu0 %v56_v55  ;;  %v114_v22 = vld [vmem:[#allocation2 + $0x268] sm:$0xff]  ;;  %v113_v26 = vld [vmem:[#allocation2 + $0x260] sm:$0xff]  ;;  %v128_v28 = vld [vmem:[#allocation2 + $0x2d8] sm:$0xff] }
  0x29   :  { %660 = vmatprep.subr.mxu1 %v88_v56  ;;  %626 = vmatpush3.msra.mxu0 %v40_v58  ;;  %v146_v23 = vld [vmem:[#allocation2 + $0x368] sm:$0xff]  ;;  %v145_v27 = vld [vmem:[#allocation2 + $0x360] sm:$0xff]  ;;  %v160_v29 = vld [vmem:[#allocation2 + $0x3d8] sm:$0xff] }
  0x2a   :  { %661 = vmatpush3.msra.mxu1 %v72_v59  ;;  %627 = vmatprep.subr.mxu0 %v55_v60  ;;  %v112_v30 = vld [vmem:[#allocation2 + $0x258] sm:$0xff]  ;;  %v127_v32 = vld [vmem:[#allocation2 + $0x2d0] sm:$0xff]  ;;  %v126_v36 = vld [vmem:[#allocation2 + $0x2c8] sm:$0xff] }
  0x2b   :  { %662 = vmatprep.subr.mxu1 %v87_v61  ;;  %628 = vmatpush3.msra.mxu0 %v39_v63  ;;  %v144_v31 = vld [vmem:[#allocation2 + $0x358] sm:$0xff]  ;;  %v159_v33 = vld [vmem:[#allocation2 + $0x3d0] sm:$0xff]  ;;  %v158_v37 = vld [vmem:[#allocation2 + $0x3c8] sm:$0xff] }
  0x2c   :  { %663 = vmatpush3.msra.mxu1 %v71_v0  ;;  %629 = vmatprep.subr.mxu0 %v54_v1  ;;  %v111_v34 = vld [vmem:[#allocation2 + $0x250] sm:$0xff]  ;;  %v110_v38 = vld [vmem:[#allocation2 + $0x248] sm:$0xff]  ;;  %v125_v40 = vld [vmem:[#allocation2 + $0x2c0] sm:$0xff] }
  0x2d   :  { %664 = vmatprep.subr.mxu1 %v86_v2  ;;  %630 = vmatpush3.msra.mxu0 %v38_v4  ;;  %v143_v35 = vld [vmem:[#allocation2 + $0x350] sm:$0xff]  ;;  %v142_v39 = vld [vmem:[#allocation2 + $0x348] sm:$0xff]  ;;  %v157_v41 = vld [vmem:[#allocation2 + $0x3c0] sm:$0xff] }
  0x2e   :  { %665 = vmatpush3.msra.mxu1 %v70_v5  ;;  %631 = vmatprep.subr.mxu0 %v53_v6  ;;  %v109_v42 = vld [vmem:[#allocation2 + $0x240] sm:$0xff]  ;;  %v124_v44 = vld [vmem:[#allocation2 + $0x2b8] sm:$0xff]  ;;  %v123_v48 = vld [vmem:[#allocation2 + $0x2b0] sm:$0xff] }
  0x2f   :  { %666 = vmatprep.subr.mxu1 %v85_v7  ;;  %632 = vmatpush3.msra.mxu0 %v37_v9  ;;  %v141_v43 = vld [vmem:[#allocation2 + $0x340] sm:$0xff]  ;;  %v156_v45 = vld [vmem:[#allocation2 + $0x3b8] sm:$0xff]  ;;  %v155_v49 = vld [vmem:[#allocation2 + $0x3b0] sm:$0xff] }
  0x30   :  { %280 = vmatprep.mubr.f32.mxu0 %v189_v8  ;;  %667 = vmatpush3.msra.mxu1 %v69_v10  ;;  %v108_v46 = vld [vmem:[#allocation2 + $0x238] sm:$0xff]  ;;  %v107_v50 = vld [vmem:[#allocation2 + $0x230] sm:$0xff]  ;;  %v122_v53 = vld [vmem:[#allocation2 + $0x2a8] sm:$0xff] }
  0x31   :  { %281 = vmatmul.mubr.f32.vlgmr.msra.gmra.mxu0 %v181_v62  ;;  %350 = vmatprep.mubr.f32.mxu1 %v190_v11  ;;  %v140_v47 = vld [vmem:[#allocation2 + $0x338] sm:$0xff]  ;;  %v139_v52 = vld [vmem:[#allocation2 + $0x330] sm:$0xff]  ;;  %v154_v54 = vld [vmem:[#allocation2 + $0x3a8] sm:$0xff] }
  0x32   :  { %671 = vmatprep.subr.mxu0 %v132_v12  ;;  %706 = vmatprep.subr.mxu1 %v164_v13  ;;  %v36_v55 = vld [vmem:[%s883_s0 + $0x8] sm:$0xff]  ;;  %v121_v58 = vld [vmem:[#allocation2 + $0x2a0] sm:$0xff]  ;;  %v120_v63 = vld [vmem:[#allocation2 + $0x298] sm:$0xff] }
  0x33   :  { %351 = vmatmul.mubr.f32.vlgmr.msra.gmra.mxu1 %v188_v3  ;;  %672 = vmatpush3.msra.mxu0 %v116_v14  ;;  %v106_v56 = vld [vmem:[#allocation2 + $0x228] sm:$0xff]  ;;  %v153_v59 = vld [vmem:[#allocation2 + $0x3a0] sm:$0xff]  ;;  %v191_v62 = vcombine.high %v36_v55, %v36_v55  ;;  %v152_v0 = vld [vmem:[#allocation2 + $0x398] sm:$0xff]  ;;  %v198_v5 = vrot.slane %v36_v55, %v850_v51 }
  0x34   :  { %707 = vmatpush3.msra.mxu1 %v148_v15  ;;  %673 = vmatprep.subr.mxu0 %v131_v16  ;;  %v138_v57 = vld [vmem:[#allocation2 + $0x328] sm:$0xff]  ;;  %v105_v60 = vld [vmem:[#allocation2 + $0x220] sm:$0xff]  ;;  %v104_v1 = vld [vmem:[#allocation2 + $0x218] sm:$0xff] }
  0x35   :  { %708 = vmatprep.subr.mxu1 %v163_v17  ;;  %674 = vmatpush3.msra.mxu0 %v115_v18  ;;  %v137_v61 = vld [vmem:[#allocation2 + $0x320] sm:$0xff]  ;;  %v136_v2 = vld [vmem:[#allocation2 + $0x318] sm:$0xff]  ;;  %v119_v3 = vld [vmem:[#allocation2 + $0x290] sm:$0xff]  ;;  %v205_v8 = vrot.slane %v191_v62, %v850_v51  ;;  %v206_v15 = vcombine.high %v198_v5, %v198_v5  ;;  %v814_v18 = vmov 0.0  }
  0x36   :  { %709 = vmatpush3.msra.mxu1 %v147_v19  ;;  %675 = vmatprep.subr.mxu0 %v130_v20  ;;  %v151_v4 = vld [vmem:[#allocation2 + $0x390] sm:$0xff]  ;;  %v118_v9 = vld [vmem:[#allocation2 + $0x288] sm:$0xff]  ;;  %v117_v13 = vld [vmem:[#allocation2 + $0x280] sm:$0xff] }
  0x37   :  { %710 = vmatprep.subr.mxu1 %v162_v21  ;;  %676 = vmatpush3.msra.mxu0 %v114_v22  ;;  %v103_v6 = vld [vmem:[#allocation2 + $0x210] sm:$0xff]  ;;  %v150_v10 = vld [vmem:[#allocation2 + $0x388] sm:$0xff]  ;;  %v149_v14 = vld [vmem:[#allocation2 + $0x380] sm:$0xff]  ;;  %v207_v17 = vcombine.high %v205_v8, %v205_v8 }
  0x38   :  { %711 = vmatpush3.msra.mxu1 %v146_v23  ;;  %677 = vmatprep.subr.mxu0 %v129_v24  ;;  %v135_v7 = vld [vmem:[#allocation2 + $0x310] sm:$0xff]  ;;  %v102_v11 = vld [vmem:[#allocation2 + $0x208] sm:$0xff]  ;;  %v101_v16 = vld [vmem:[#allocation2 + $0x200] sm:$0xff] }
  0x39   :  { %712 = vmatprep.subr.mxu1 %v161_v25  ;;  %678 = vmatpush3.msra.mxu0 %v113_v26  ;;  %v134_v12 = vld [vmem:[#allocation2 + $0x308] sm:$0xff]  ;;  %v133_v51 = vld [vmem:[#allocation2 + $0x300] sm:$0xff]  ;;  %v500_v19 = vld [vmem:[%s886_s3 + $0x18] sm:$0xff] }
  0x3a   :  { %713 = vmatpush3.msra.mxu1 %v145_v27  ;;  %679 = vmatprep.subr.mxu0 %v128_v28  ;;  %v499_v20 = vld [vmem:[%s886_s3 + $0x10] sm:$0xff]  ;;  %v498_v21 = vld [vmem:[%s886_s3 + $0x8] sm:$0xff]  ;;  %v497_v22 = vld [vmem:[%s886_s3] sm:$0xff] }
  0x3b   :  { %714 = vmatprep.subr.mxu1 %v160_v29  ;;  %680 = vmatpush3.msra.mxu0 %v112_v30  ;;  %v598_v27 = vld [vmem:[%s885_s2] ss:$0 sm:$0xff]  ;;  %s816_s2 = smov [#allocation5]  }
  0x3c   :  { %715 = vmatpush3.msra.mxu1 %v144_v31  ;;  %681 = vmatprep.subr.mxu0 %v127_v32  ;;  %s589_s13 = sshll.u32 %s816_s2, 4  ;;  %s590_s13 = int_to_ptr.vmem [resolvable:$true] %s589_s13 }
  0x3d   :  { %716 = vmatprep.subr.mxu1 %v159_v33  ;;  %682 = vmatpush3.msra.mxu0 %v111_v34  ;;  %s786_s14 = scalar_lea.vmem %s590_s13, 32  ;;  %p791_p6 = scmp.lt.s32.totalorder %s590_s13, %s590_s13 }
  0x3e   :  { %717 = vmatpush3.msra.mxu1 %v143_v35  ;;  %683 = vmatprep.subr.mxu0 %v126_v36  ;;  %p787_p5 = scmp.ne.s32.totalorder %s590_s13, %s786_s14  ;;  %p792_p7 = scmp.lt.s32.totalorder %s786_s14, %s786_s14 }
  0x3f   :  { %718 = vmatprep.subr.mxu1 %v158_v37  ;;  %684 = vmatpush3.msra.mxu0 %v110_v38 }
  0x40   :  { %719 = vmatpush3.msra.mxu1 %v142_v39  ;;  %685 = vmatprep.subr.mxu0 %v125_v40  ;;  %p793_p8 = por %p792_p7, %p791_p6 }
  0x41   :  { %720 = vmatprep.subr.mxu1 %v157_v41  ;;  %686 = vmatpush3.msra.mxu0 %v109_v42  ;;  %v599_v41 = vld [vmem:[%s887_s4] ss:$0 sm:$0xff] }
  0x42   :  { %721 = vmatpush3.msra.mxu1 %v141_v43  ;;  %687 = vmatprep.subr.mxu0 %v124_v44  ;;  %p794_p9 = pnand %p793_p8, %p787_p5 }
  0x43   :  { %722 = vmatprep.subr.mxu1 %v156_v45  ;;  %688 = vmatpush3.msra.mxu0 %v108_v46 }
  0x44   :  { %723 = vmatpush3.msra.mxu1 %v140_v47  ;;  %689 = vmatprep.subr.mxu0 %v123_v48 }
  0x45   :  { %724 = vmatprep.subr.mxu1 %v155_v49  ;;  %690 = vmatpush3.msra.mxu0 %v107_v50 }
  0x46   :  { %725 = vmatpush3.msra.mxu1 %v139_v52  ;;  %691 = vmatprep.subr.mxu0 %v122_v53 }
  0x47   :  { %726 = vmatprep.subr.mxu1 %v154_v54  ;;  %692 = vmatpush3.msra.mxu0 %v106_v56 }
  0x48   :  { %727 = vmatpush3.msra.mxu1 %v138_v57  ;;  %693 = vmatprep.subr.mxu0 %v121_v58 }
  0x49   :  { %728 = vmatprep.subr.mxu1 %v153_v59  ;;  %694 = vmatpush3.msra.mxu0 %v105_v60 }
  0x4a   :  { %729 = vmatpush3.msra.mxu1 %v137_v61  ;;  %695 = vmatprep.subr.mxu0 %v120_v63 }
  0x4b   :  { %730 = vmatprep.subr.mxu1 %v152_v0  ;;  %696 = vmatpush3.msra.mxu0 %v104_v1 }
  0x4c   :  { %731 = vmatpush3.msra.mxu1 %v136_v2  ;;  %697 = vmatprep.subr.mxu0 %v119_v3 }
  0x4d   :  { %732 = vmatprep.subr.mxu1 %v151_v4  ;;  %698 = vmatpush3.msra.mxu0 %v103_v6 }
  0x4e   :  { %733 = vmatpush3.msra.mxu1 %v135_v7  ;;  %699 = vmatprep.subr.mxu0 %v118_v9 }
  0x4f   :  { %734 = vmatprep.subr.mxu1 %v150_v10  ;;  %700 = vmatpush3.msra.mxu0 %v102_v11 }
  0x50   :  { %735 = vmatpush3.msra.mxu1 %v134_v12  ;;  %701 = vmatprep.subr.mxu0 %v117_v13 }
  0x51   :  { %736 = vmatprep.subr.mxu1 %v149_v14  ;;  %702 = vmatpush3.msra.mxu0 %v101_v16 }
  0x52   :  { %420 = vmatprep.mubr.f32.mxu0 %v206_v15  ;;  %737 = vmatpush3.msra.mxu1 %v133_v51 }
  0x53   :  { %490 = vmatprep.mubr.f32.mxu1 %v207_v17  ;;  %421 = vmatmul.mubr.f32.vlgmr.msra.gmra.mxu0 %v198_v5 }
  0x54   :  { %491 = vmatmul.mubr.f32.vlgmr.msra.gmra.mxu1 %v205_v8  ;;  %746 = vmatprep.subr.mxu0 %v814_v18 }
  0x55   :  { %747 = vmatpush3.msra.mxu0 %v500_v19  ;;  %754 = vmatprep.mubr.msk.f32.mxu0 %vm815_vm0, %v814_v18 }
  0x56   :  { %748 = vmatprep.subr.mxu0 %v814_v18 }
  0x57   :  { %749 = vmatpush3.msra.mxu0 %v499_v20 }
  0x58   :  { %750 = vmatprep.subr.mxu0 %v814_v18 }
  0x59   :  { %751 = vmatpush3.msra.mxu0 %v498_v21 }
  0x5a   :  { %752 = vmatprep.subr.mxu0 %v814_v18 }
  0x5b   :  { %753 = vmatpush3.msra.mxu0 %v497_v22 }
  0xf1   :  { %v633_v23 = vpop.f32.mrf.mxu0 }
  0xf3   :  { %v668_v24 = vpop.f32.mrf.mxu1  ;;  %v634_v25 = vpop.f32.mrf.mxu0 }
  0xf4   :  { %v635_v26 = vadd.f32 %v634_v25, %v633_v23 }
  0xf5   :  { %v669_v28 = vpop.f32.mrf.mxu1 }
  0xf6   :  { %v283_v29 = vadd.f32 %v635_v26, %v598_v27  ;;  %v670_v30 = vadd.f32 %v669_v28, %v668_v24 }
  0xf8   :  { %v353_v35 = vadd.f32 %v670_v30, %v283_v29 }
 0x113   :  { %v703_v31 = vpop.f32.mrf.mxu0 }
 0x114   :  { %v738_v32 = vpop.f32.mrf.mxu1 }
 0x115   :  { %v704_v33 = vpop.f32.mrf.mxu0 }
 0x116   :  { %v739_v34 = vpop.f32.mrf.mxu1  ;;  %v705_v36 = vadd.f32 %v704_v33, %v703_v31 }
 0x117   :  { %v740_v38 = vadd.f32 %v739_v34, %v738_v32 }
 0x118   :  { %v423_v37 = vadd.f32 %v705_v36, %v353_v35 }
 0x11a   :  { %v493_v39 = vadd.f32 %v740_v38, %v423_v37 }
 0x11c   :  { %v496_v40 = vmax.f32 %v493_v39, 0.0 }
 0x11e   :  { %755 = vmatmul.mubr.msk.f32.vlgmr.msra.gmra.mxu0 %vm508_vm1, %v496_v40 }
 0x1de   :  { %v578_v42 = vpop.f32.mrf.mxu0 }
 0x1df   :  { %v579_v43 = vadd.f32 %v599_v41, %v578_v42 }
 0x1e0   :  { %v756_v44 = vpop.f32.mrf.mxu0 }
 0x1e1   :  { %582 = vst [vmem:[#allocation5] sm:$0x3] %v579_v43 }
 0x1e2   :  { %797 = shalt.err (!%p794_p9)
}
 0x1e3   :  { %592 = dma.vmem_to_hbm [thread:$0]  %s590_s13, 32, %s888_s5, [#allocation4]  }
 0x1e4   :  { %808 = dma.done.wait [#allocation4], 32  }
 0x1e5   :  { %809 = vsyncadd [#allocation4], 4294967264 }
 0x1e6   :  { %596 = vsyncpa [#allocation3], 1 }
 0x1e7   :  { %597 = vsyncpa [#allocation4], 1 }

</bundles_post_ra>
